<compile_context>
chip_gen: v5e
topology: v5e:2x2
jax: 0.10.0
libtpu: 0.0.40
codegen_flags: <defaults>
</compile_context>

<pallas_src>
import jax
import jax.numpy as jnp
from jax.experimental import pallas as pl
from jax.experimental.pallas import tpu as pltpu


def _round_up(x, m):
    return ((x + m - 1) // m) * m


def _choose_batch_tile(B):
    """Batch rows per grid step."""
    if B <= 16:
        return B                       # single tile; block dim == array dim
    # >= 2 grid steps (lets v7x shard the parallel axis over both TCs),
    # capped at 512 rows — large enough to amortize per-step overhead,
    # trivially small in VMEM even on v7x (64 MiB).
    return min(512, _round_up((B + 1) // 2, 8))


def _qnet_kernel(s_ref, a_ref, w1_ref, b1_ref, w2_ref, b2_ref, w3_ref, b3_ref,
                 o_ref, cat_ref):
    # s_ref: (TB, F) f32      w1: (F+A, H) bf16   b1: (1, H) f32
    # a_ref: (TB, A) f32      w2: (H,   H) bf16   b2: (1, H) f32
    #                         w3: (1,   H) f32    b3: (1, 1) f32  (SMEM)
    # o_ref: (1, 1, TB) f32   cat_ref: (TB, F+A) f32 VMEM scratch
    F = s_ref.shape[1]

    # In-kernel concat of [state, action] into a VMEM scratch (replaces the
    # host-side torch.cat); cast to bf16 once for a single fused fc1 dot.
    cat_ref[:, :F] = s_ref[...]
    cat_ref[:, F:] = a_ref[...]
    x = cat_ref[...].astype(jnp.bfloat16)

    # fc1: bf16 MXU dot, f32 accumulate, f32 bias + ReLU (v5e VPU is f32-only).
    h1 = jnp.dot(x, w1_ref[...], preferred_element_type=jnp.float32) + b1_ref[...]
    h1 = jnp.maximum(h1, 0.0)

    # fc2: bf16 MXU dot, f32 accumulate, f32 bias + ReLU.
    h2 = jnp.dot(h1.astype(jnp.bfloat16), w2_ref[...],
                 preferred_element_type=jnp.float32) + b2_ref[...]
    h2 = jnp.maximum(h2, 0.0)

    # fc3 (out_features=1): VPU multiply + XLU lane-reduce against the (1, H)
    # weight row instead of an (H, 1) matmul that wastes the MXU; b3 is a
    # free SMEM scalar add.
    q_col = jnp.sum(h2 * w3_ref[...], axis=-1, keepdims=True) + b3_ref[0, 0]

    # Lane-dense store: transpose the (TB, 1) column into a (1, TB) row so the
    # output writeback is a contiguous, unmasked vst instead of TB masked
    # 4-byte stores.
    q_row = jnp.transpose(q_col)                      # (1, TB)
    o_ref[...] = q_row.reshape(o_ref.shape).astype(o_ref.dtype)


def qnetwork_forward(state, action, params):
    """Pallas forward pass. state: (B, F) f32, action: (B, A) f32 -> (B, 1) f32."""
    w1, b1, w2, b2, w3_row, b3 = params
    B, F_ = state.shape
    A = action.shape[1]
    H = w2.shape[0]

    TB = _choose_batch_tile(B)
    G = pl.cdiv(B, TB)   # last input tile may be ragged; those rows are sliced off

    def resident(arr):
        # Grid-invariant block: weight stays resident in VMEM across all steps.
        return pl.BlockSpec(arr.shape, lambda i: (0,) * arr.ndim)

    flops = 2 * G * TB * ((F_ + A) * H + H * H + H)
    bytes_accessed = (B * (F_ + A) * 4                 # state/action (f32)
                      + (F_ + A) * H * 2 + H * H * 2   # bf16 weights
                      + (2 * H + H + 1) * 4            # biases + w3 row (f32)
                      + G * TB * 4)                    # output

    out = pl.pallas_call(
        _qnet_kernel,
        out_shape=jax.ShapeDtypeStruct((G, 1, TB), jnp.float32),
        grid_spec=pltpu.PrefetchScalarGridSpec(
            num_scalar_prefetch=0,
            grid=(G,),
            in_specs=[
                pl.BlockSpec((TB, F_), lambda i: (i, 0)),   # state tile (f32)
                pl.BlockSpec((TB, A), lambda i: (i, 0)),    # action tile (f32)
                resident(w1), resident(b1),
                resident(w2), resident(b2),
                resident(w3_row),
                pl.BlockSpec(memory_space=pltpu.MemorySpace.SMEM),  # b3 scalar
            ],
            out_specs=pl.BlockSpec((1, 1, TB), lambda i: (i, 0, 0)),
            scratch_shapes=[pltpu.VMEM((TB, F_ + A), jnp.float32)],
        ),
        compiler_params=pltpu.CompilerParams(
            dimension_semantics=("parallel",)),   # lets v7x use both TCs
        cost_estimate=pl.CostEstimate(flops=int(flops), transcendentals=0,
                                      bytes_accessed=int(bytes_accessed)),
    )(state, action, w1, b1, w2, b2, w3_row, b3)

    # (G, 1, TB) lane-major rows -> (B, 1) column (row order is preserved).
    return out.reshape(G * TB, 1)[:B]


def init_qnetwork_params(key, feature_dim, action_dim, hidden_dim=256):
    """Deterministic init mimicking torch.nn.Linear (uniform +-1/sqrt(fan_in)).

    Matmul weights are bf16 (in, out) layout; biases and the fc3 row stay f32.
    """
    def linear(k, fan_in, fan_out):
        kw, kb = jax.random.split(k)
        bound = 1.0 / jnp.sqrt(jnp.float32(fan_in))
        w = jax.random.uniform(kw, (fan_in, fan_out), jnp.float32, -bound, bound)
        b = jax.random.uniform(kb, (1, fan_out), jnp.float32, -bound, bound)
        return w, b

    k1, k2, k3 = jax.random.split(key, 3)
    w1, b1 = linear(k1, feature_dim + action_dim, hidden_dim)
    w2, b2 = linear(k2, hidden_dim, hidden_dim)
    w3, b3 = linear(k3, hidden_dim, 1)

    return (w1.astype(jnp.bfloat16), b1,
            w2.astype(jnp.bfloat16), b2,
            w3.T,   # (1, H) f32 row used in the VPU/XLU reduction
            b3)     # (1, 1) f32 scalar (SMEM)


def qnetwork_reference(state, action, params):
    """Pure-JAX reference with the same bf16/f32 recipe as the kernel."""
    w1, b1, w2, b2, w3_row, b3 = params
    x = jnp.concatenate([state, action], axis=1).astype(jnp.bfloat16)
    h1 = jnp.maximum(jnp.dot(x, w1, preferred_element_type=jnp.float32) + b1, 0.0)
    h2 = jnp.maximum(jnp.dot(h1.astype(jnp.bfloat16), w2,
                             preferred_element_type=jnp.float32) + b2, 0.0)
    return jnp.sum(h2 * w3_row, axis=-1, keepdims=True) + b3[0, 0]


def qnetwork_reference_f32(state, action, params):
    """Full-f32 reference (sanity check that bf16 didn't change semantics)."""
    w1, b1, w2, b2, w3_row, b3 = params
    x = jnp.concatenate([state, action], axis=1)
    h1 = jnp.maximum(x @ w1.astype(jnp.float32) + b1, 0.0)
    h2 = jnp.maximum(h1 @ w2.astype(jnp.float32) + b2, 0.0)
    return jnp.sum(h2 * w3_row, axis=-1, keepdims=True) + b3[0, 0]


if __name__ == "__main__":
    # Small shapes consistent with the module's forward.
    batch, feature_dim, action_dim, hidden_dim = 8, 16, 8, 32

    key = jax.random.PRNGKey(0)
    k_params, k_state, k_action = jax.random.split(key, 3)

    params = init_qnetwork_params(k_params, feature_dim, action_dim, hidden_dim)
    state = jax.random.normal(k_state, (batch, feature_dim), jnp.float32)
    action = jax.random.normal(k_action, (batch, action_dim), jnp.float32)

    q = jax.block_until_ready(qnetwork_forward(state, action, params))
    q_ref = qnetwork_reference(state, action, params)
    q_ref_f32 = qnetwork_reference_f32(state, action, params)

    assert q.shape == (batch, 1)
    # Kernel matches the bf16-matmul / f32-accumulate reference closely
    # (tolerance loosened vs. 1e-4: MXU accumulation order differs from XLA's).
    assert jnp.allclose(q, q_ref, atol=2e-3, rtol=2e-3)
    # And the full-f32 math loosely (bf16 rounding only).
    assert jnp.allclose(q, q_ref_f32, atol=5e-2, rtol=5e-2)

    # Second check: multi-tile, lane-dense output path (grid of 2 batch tiles).
    batch2 = 256
    k_s2, k_a2 = jax.random.split(jax.random.PRNGKey(1))
    state2 = jax.random.normal(k_s2, (batch2, feature_dim), jnp.float32)
    action2 = jax.random.normal(k_a2, (batch2, action_dim), jnp.float32)
    q2 = jax.block_until_ready(qnetwork_forward(state2, action2, params))
    q2_ref = qnetwork_reference(state2, action2, params)
    assert q2.shape == (batch2, 1)
    assert jnp.allclose(q2, q2_ref, atol=2e-3, rtol=2e-3)

    print("KERNEL_OK")
</pallas_src>

<mosaic_0001>
module attributes {stable_mosaic.version = 11 : i64} {
  func.func @_qnet_kernel(%arg0: i32, %arg1: memref<8x16xf32, #tpu.memory_space<vmem>>, %arg2: memref<8x8xf32, #tpu.memory_space<vmem>>, %arg3: memref<24x32xbf16, #tpu.memory_space<vmem>>, %arg4: memref<1x32xf32, #tpu.memory_space<vmem>>, %arg5: memref<32x32xbf16, #tpu.memory_space<vmem>>, %arg6: memref<1x32xf32, #tpu.memory_space<vmem>>, %arg7: memref<1x32xf32, #tpu.memory_space<vmem>>, %arg8: memref<1x1xf32, #tpu.memory_space<smem>>, %arg9: memref<1x1x8xf32, #tpu.memory_space<vmem>>, %arg10: memref<8x24xf32, #tpu.memory_space<vmem>>) attributes {dimension_semantics = [#tpu.dimension_semantics<parallel>], iteration_bounds = array<i64: 1>, scalar_prefetch = 0 : i64, scratch_operands = 1 : i64, tpu.core_type = #tpu.core_type<tc>, window_params = [{transform_indices = @transform_0, window_bounds = array<i64: 8, 16>}, {transform_indices = @transform_1, window_bounds = array<i64: 8, 8>}, {pipeline_mode = #tpu.pipeline_mode<synchronous>, transform_indices = @transform_2, window_bounds = array<i64: 24, 32>}, {pipeline_mode = #tpu.pipeline_mode<synchronous>, transform_indices = @transform_3, window_bounds = array<i64: 1, 32>}, {pipeline_mode = #tpu.pipeline_mode<synchronous>, transform_indices = @transform_4, window_bounds = array<i64: 32, 32>}, {pipeline_mode = #tpu.pipeline_mode<synchronous>, transform_indices = @transform_5, window_bounds = array<i64: 1, 32>}, {pipeline_mode = #tpu.pipeline_mode<synchronous>, transform_indices = @transform_6, window_bounds = array<i64: 1, 32>}, {transform_indices = @transform_7, window_bounds = array<i64: 1, 1>}, {transform_indices = @transform_8, window_bounds = array<i64: 1, 1, 8>}]} {
    %c0 = arith.constant 0 : index
    %c0_0 = arith.constant 0 : index
    %0 = vector.load %arg1[%c0, %c0_0] : memref<8x16xf32, #tpu.memory_space<vmem>>, vector<8x16xf32>
    %c0_1 = arith.constant 0 : index
    %c0_2 = arith.constant 0 : index
    %1 = vector.load %arg10[%c0_1, %c0_2] : memref<8x24xf32, #tpu.memory_space<vmem>>, vector<8x16xf32>
    tpu.vector_store %arg10[%c0_1, %c0_2], %0 {strides = array<i32>} : memref<8x24xf32, #tpu.memory_space<vmem>>, vector<8x16xf32>,
    %c0_3 = arith.constant 0 : index
    %c0_4 = arith.constant 0 : index
    %2 = vector.load %arg2[%c0_3, %c0_4] : memref<8x8xf32, #tpu.memory_space<vmem>>, vector<8x8xf32>
    %c0_5 = arith.constant 0 : index
    %c16 = arith.constant 16 : index
    %3 = vector.load %arg10[%c0_5, %c16] : memref<8x24xf32, #tpu.memory_space<vmem>>, vector<8x8xf32>
    tpu.vector_store %arg10[%c0_5, %c16], %2 {strides = array<i32>} : memref<8x24xf32, #tpu.memory_space<vmem>>, vector<8x8xf32>,
    %c0_6 = arith.constant 0 : index
    %c0_7 = arith.constant 0 : index
    %4 = vector.load %arg10[%c0_6, %c0_7] : memref<8x24xf32, #tpu.memory_space<vmem>>, vector<8x24xf32>
    %5 = arith.truncf %4 : vector<8x24xf32> to vector<8x24xbf16>
    %c0_8 = arith.constant 0 : index
    %c0_9 = arith.constant 0 : index
    %6 = vector.load %arg3[%c0_8, %c0_9] : memref<24x32xbf16, #tpu.memory_space<vmem>>, vector<24x32xbf16>
    %cst = arith.constant dense<0.000000e+00> : vector<8x32xf32>
    %7 = tpu.matmul %5, %6, %cst {dimension_numbers = #tpu.dot_dimension_numbers<[1], [0], [0], [1], [0, 0, 1, 1], [], []>} : vector<8x24xbf16>, vector<24x32xbf16>, vector<8x32xf32> -> vector<8x32xf32>
    %c0_10 = arith.constant 0 : index
    %c0_11 = arith.constant 0 : index
    %8 = vector.load %arg4[%c0_10, %c0_11] : memref<1x32xf32, #tpu.memory_space<vmem>>, vector<1x32xf32>
    %9 = vector.broadcast %8 : vector<1x32xf32> to vector<8x32xf32>
    %10 = arith.addf %7, %9 : vector<8x32xf32>
    %cst_12 = arith.constant 0.000000e+00 : f32
    %11 = vector.broadcast %cst_12 : f32 to vector<8x32xf32>
    %12 = arith.maximumf %10, %11 : vector<8x32xf32>
    %13 = arith.truncf %12 : vector<8x32xf32> to vector<8x32xbf16>
    %c0_13 = arith.constant 0 : index
    %c0_14 = arith.constant 0 : index
    %14 = vector.load %arg5[%c0_13, %c0_14] : memref<32x32xbf16, #tpu.memory_space<vmem>>, vector<32x32xbf16>
    %cst_15 = arith.constant dense<0.000000e+00> : vector<8x32xf32>
    %15 = tpu.matmul %13, %14, %cst_15 {dimension_numbers = #tpu.dot_dimension_numbers<[1], [0], [0], [1], [0, 0, 1, 1], [], []>} : vector<8x32xbf16>, vector<32x32xbf16>, vector<8x32xf32> -> vector<8x32xf32>
    %c0_16 = arith.constant 0 : index
    %c0_17 = arith.constant 0 : index
    %16 = vector.load %arg6[%c0_16, %c0_17] : memref<1x32xf32, #tpu.memory_space<vmem>>, vector<1x32xf32>
    %17 = vector.broadcast %16 : vector<1x32xf32> to vector<8x32xf32>
    %18 = arith.addf %15, %17 : vector<8x32xf32>
    %cst_18 = arith.constant 0.000000e+00 : f32
    %19 = vector.broadcast %cst_18 : f32 to vector<8x32xf32>
    %20 = arith.maximumf %18, %19 : vector<8x32xf32>
    %c0_19 = arith.constant 0 : index
    %c0_20 = arith.constant 0 : index
    %21 = vector.load %arg7[%c0_19, %c0_20] : memref<1x32xf32, #tpu.memory_space<vmem>>, vector<1x32xf32>
    %22 = vector.broadcast %21 : vector<1x32xf32> to vector<8x32xf32>
    %23 = arith.mulf %20, %22 : vector<8x32xf32>
    %cst_21 = arith.constant dense<0.000000e+00> : vector<8xf32>
    %24 = vector.multi_reduction <add>, %23, %cst_21 [1] : vector<8x32xf32> to vector<8xf32>
    %25 = vector.shape_cast %24 : vector<8xf32> to vector<8x1xf32>
    %c0_22 = arith.constant 0 : index
    %c0_23 = arith.constant 0 : index
    %26 = memref.load %arg8[%c0_22, %c0_23] : memref<1x1xf32, #tpu.memory_space<smem>>
    %27 = vector.broadcast %26 : f32 to vector<8x1xf32>
    %28 = arith.addf %25, %27 : vector<8x1xf32>
    %29 = tpu.transpose %28, [1, 0] : vector<8x1xf32> -> vector<1x8xf32>
    %30 = vector.shape_cast %29 : vector<1x8xf32> to vector<1x1x8xf32>
    %c0_24 = arith.constant 0 : index
    %c0_25 = arith.constant 0 : index
    %c0_26 = arith.constant 0 : index
    %31 = vector.load %arg9[%c0_24, %c0_25, %c0_26] : memref<1x1x8xf32, #tpu.memory_space<vmem>>, vector<1x1x8xf32>
    tpu.vector_store %arg9[%c0_24, %c0_25, %c0_26], %30 {strides = array<i32>} : memref<1x1x8xf32, #tpu.memory_space<vmem>>, vector<1x1x8xf32>,
    return
  }
  func.func @transform_0(%arg0: i32) -> (i32, i32) {
    %c0_i32 = arith.constant 0 : i32
    %c0_i32_0 = arith.constant 0 : i32
    return %arg0, %c0_i32 : i32, i32
  }
  func.func @transform_1(%arg0: i32) -> (i32, i32) {
    %c0_i32 = arith.constant 0 : i32
    %c0_i32_0 = arith.constant 0 : i32
    return %arg0, %c0_i32 : i32, i32
  }
  func.func @transform_2(%arg0: i32) -> (i32, i32) {
    %c0_i32 = arith.constant 0 : i32
    %c0_i32_0 = arith.constant 0 : i32
    %c0_i32_1 = arith.constant 0 : i32
    return %c0_i32, %c0_i32_0 : i32, i32
  }
  func.func @transform_3(%arg0: i32) -> (i32, i32) {
    %c0_i32 = arith.constant 0 : i32
    %c0_i32_0 = arith.constant 0 : i32
    %c0_i32_1 = arith.constant 0 : i32
    return %c0_i32, %c0_i32_0 : i32, i32
  }
  func.func @transform_4(%arg0: i32) -> (i32, i32) {
    %c0_i32 = arith.constant 0 : i32
    %c0_i32_0 = arith.constant 0 : i32
    %c0_i32_1 = arith.constant 0 : i32
    return %c0_i32, %c0_i32_0 : i32, i32
  }
  func.func @transform_5(%arg0: i32) -> (i32, i32) {
    %c0_i32 = arith.constant 0 : i32
    %c0_i32_0 = arith.constant 0 : i32
    %c0_i32_1 = arith.constant 0 : i32
    return %c0_i32, %c0_i32_0 : i32, i32
  }
  func.func @transform_6(%arg0: i32) -> (i32, i32) {
    %c0_i32 = arith.constant 0 : i32
    %c0_i32_0 = arith.constant 0 : i32
    %c0_i32_1 = arith.constant 0 : i32
    return %c0_i32, %c0_i32_0 : i32, i32
  }
  func.func @transform_7(%arg0: i32) -> (i32, i32) {
    %c0_i32 = arith.constant 0 : i32
    %c0_i32_0 = arith.constant 0 : i32
    %c0_i32_1 = arith.constant 0 : i32
    return %c0_i32, %c0_i32_0 : i32, i32
  }
  func.func @transform_8(%arg0: i32) -> (i32, i32, i32) {
    %c0_i32 = arith.constant 0 : i32
    %c0_i32_0 = arith.constant 0 : i32
    %c0_i32_1 = arith.constant 0 : i32
    return %arg0, %c0_i32, %c0_i32_0 : i32, i32, i32
  }
}

</mosaic_0001>

<bundles_post_ra>
// kernel: tpu_custom_call.1
= control target key start
LH: loop header
LB: loop body
LE: loop exit
PB: predicated region body
PF: predicated region fallthrough
CT: control target
= control target key end

     0   :  { %14 = vsyncpa [#allocation5], 0  ;;  %s481_s0 = inlined_call_operand.hbm [shape: f32[8,16], index: 0, kind: input, shape index: {}]   ;;  %s482_s1 = inlined_call_operand.hbm [shape: f32[8,8], index: 1, kind: input, shape index: {}]   ;;  %s483_s2 = inlined_call_operand.hbm [shape: bf16[24,32], index: 2, kind: input, shape index: {}]   ;;  %s484_s3 = inlined_call_operand.vmem [shape: f32[1,32], index: 3, kind: input, shape index: {}]   ;;  %s485_s4 = inlined_call_operand.hbm [shape: bf16[32,32], index: 4, kind: input, shape index: {}]   ;;  %s486_s5 = inlined_call_operand.vmem [shape: f32[1,32], index: 5, kind: input, shape index: {}]   ;;  %s487_s6 = inlined_call_operand.vmem [shape: f32[1,32], index: 6, kind: input, shape index: {}]   ;;  %s488_s7 = inlined_call_operand.<no memory space> [shape: f32[1,1], index: 7, kind: input, shape index: {}]   ;;  %s489_s8 = inlined_call_operand.hbm [shape: f32[1,1,8], index: 8, kind: output, shape index: {}]  }
   0x1   :  { %15 = vsyncpa [#allocation8], 0 }
   0x2   :  { %16 = vsyncpa [#allocation11], 0  ;;  %s34_s29 = sshll.u32 %s482_s1, 4  ;;  %s35_s29 = int_to_ptr.hbm [resolvable:$true] %s34_s29 }
   0x3   :  { %17 = vsyncpa [#allocation6], 0  ;;  %s401_s30 = smov [#allocation7]   ;;  %s23_s12 = sshll.u32 %s481_s0, 4  ;;  %s24_s12 = int_to_ptr.hbm [resolvable:$true] %s23_s12 }
   0x4   :  { %s36_s9 = sshll.u32 %s401_s30, 4  ;;  %s402_s13 = smov [#allocation4]   ;;  %s37_s9 = int_to_ptr.vmem [resolvable:$true] %s36_s9 }
   0x5   :  { %39 = dma.hbm_to_vmem [thread:$0]  %s35_s29, 128, %s37_s9, [#allocation8]  }
   0x6   :  { %s25_s14 = sshll.u32 %s402_s13, 4  ;;  %s44_s17 = sshll.u32 %s483_s2, 4  ;;  %s26_s14 = int_to_ptr.vmem [resolvable:$true] %s25_s14  ;;  %s45_s17 = int_to_ptr.hbm [resolvable:$true] %s44_s17 }
   0x7   :  { %28 = dma.hbm_to_vmem [thread:$0]  %s24_s12, 128, %s26_s14, [#allocation5]  }
   0x8   :  { %s403_s1 = smov [#allocation9]   ;;  %s59_s21 = sshll.u32 %s485_s4, 4  ;;  %s60_s21 = int_to_ptr.hbm [resolvable:$true] %s59_s21 }
   0x9   :  { %s46_s18 = sshll.u32 %s403_s1, 4  ;;  %s404_s22 = smov 64   ;;  %s47_s18 = int_to_ptr.vmem [resolvable:$true] %s46_s18 }
   0xa   :  { %s405_s0 = smov 4   ;;  %s406_s23 = smov [#allocation10]  }
   0xb   :  { %52 = dma.hbm_to_vmem [thread:$0]  %s45_s17, 192, %s47_s18, [#allocation8], %s404_s22, %s404_s22, %s405_s0  }
   0xc   :  { %s61_s24 = sshll.u32 %s406_s23, 4  ;;  %s62_s24 = int_to_ptr.vmem [resolvable:$true] %s61_s24 }
   0xd   :  { %67 = dma.hbm_to_vmem [thread:$0]  %s60_s21, 256, %s62_s24, [#allocation11], %s404_s22, %s404_s22, %s405_s0  }
   0xe   :  { %393 = dma.done.wait [#allocation5], 128  }
   0xf   :  { %394 = vsyncadd [#allocation5], 4294967168 }
  0x10   :  { %395 = dma.done.wait [#allocation8], 320  }
  0x11   :  { %396 = vsyncadd [#allocation8], 4294966976 }
  0x12   :  { %397 = dma.done.wait [#allocation11], 256  }
  0x13   :  { %398 = vsyncadd [#allocation11], 4294967040  ;;  %v94_v0 = vld [vmem:[#allocation7] sm:$0xff]  ;;  %s407_s2 = smov 16   ;;  %vm92_vm0 = vcmask 130048   ;;  %v91_v2 = vld [vmem:[#allocation4] sm:$0xff]  ;;  %v189_v26 = vstv %s488_s7 }
  0x14   :  { %96 = vrot.lane.b32.xlu0 %v94_v0, %s407_s2  ;;  %v105_v1 = vld [vmem:[#allocation9 + $0x8] sm:$0xf]  ;;  %93 = vst.msk [vmem:[#allocation2] sm:$0xff] %vm92_vm0, %v91_v2  ;;  %vm123_vm1 = vcmask 1043456   ;;  %v258_v6 = vld [vmem:[#allocation9] sm:$0xff]  ;;  %vm99_vm2 = vcmask 195712  }
  0x15   :  { %v115_v3 = vunpack.c.l.b16 %v105_v1  ;;  %vm119_vm3 = vcmask 195584   ;;  %v260_v10 = vld [vmem:[#allocation10 + $0x8] sm:$0xff]  ;;  %v259_v11 = vld [vmem:[#allocation10] sm:$0xff]  ;;  %v270_v12 = vld [vmem:[%s484_s3] ss:$0 sm:$0xff]  ;;  %vm162_vm4 = vcmask 261120  }
  0x16   :  { %172 = vmatpush.bf16.msra.mxu1 %v260_v10  ;;  %v271_v18 = vld [vmem:[%s486_s5] ss:$0 sm:$0xff]  ;;  %s408_s9 = smov [#allocation12]   ;;  %s232_s12 = sshll.u32 %s489_s8, 4  ;;  %vm223_vm5 = vcmask 57344   ;;  %s233_s12 = int_to_ptr.hbm [resolvable:$true] %s232_s12 }
  0x17   :  { %v117_v4 = vpack.c.b16 %v115_v3, %v115_v3  ;;  %v272_v21 = vld [vmem:[%s487_s6] ss:$0 sm:$0xff]  ;;  %s230_s5 = sshll.u32 %s408_s9, 4  ;;  %s231_s5 = int_to_ptr.vmem [resolvable:$true] %s230_s5 }
  0x19   :  { %v125_v5 = vsel %vm123_vm1, %v117_v4, 0 }
  0x1a   :  { %133 = vmatpush.bf16.msra.mxu0 %v125_v5  ;;  %173 = vmatpush.bf16.msra.mxu1 %v259_v11 }
  0x1e   :  { %134 = vmatpush.bf16.msra.mxu0 %v258_v6 }
  0x86   :  { %v97_v7 = vpop.permute.xlu0 %96 }
  0x87   :  { %100 = vst.msk [vmem:[#allocation2] sm:$0xff] %vm99_vm2, %v97_v7 }
  0x8e   :  { %v101_v8 = vld [vmem:[#allocation2] sm:$0xff] }
  0x8f   :  { %v102_v9 = vpack.c.bf16 %v101_v8, %v101_v8 }
  0x91   :  { %248 = vmatmul.msk.bf16.vlgmr.msra.gmra.mxu0 %vm119_vm3, %v102_v9 }
 0x10e   :  { %v136_v13 = vpop.f32.mrf.mxu0 }
 0x10f   :  { %v137_v14 = vadd.f32 %v270_v12, %v136_v13 }
 0x111   :  { %v140_v15 = vmax.f32 %v137_v14, 0.0 }
 0x113   :  { %v141_v16 = vpack.c.bf16 %v140_v15, %v140_v15 }
 0x115   :  { %257 = vmatmul.msk.bf16.vlgmr.msra.gmra.mxu1 %vm162_vm4, %v141_v16 }
 0x116   :  { %v138_v17 = vpop.f32.mrf.mxu0 }
 0x192   :  { %v175_v19 = vpop.f32.mrf.mxu1 }
 0x193   :  { %v176_v20 = vadd.f32 %v271_v18, %v175_v19 }
 0x195   :  { %v179_v22 = vmax.f32 %v176_v20, 0.0 }
 0x197   :  { %v184_v23 = vmul.f32 %v272_v21, %v179_v22 }
 0x199   :  { %v185_v24 = vsel %vm162_vm4, %v184_v23, 0.0 }
 0x19a   :  { %v177_v25 = vpop.f32.mrf.mxu1  ;;  %186 = vadd.xlane.f32.xlu0 %v185_v24 }
 0x20d   :  { %v187_v27 = vpop.xlane.xlu0 %186 }
 0x20e   :  { %v190_v28 = vadd.f32 %v189_v26, %v187_v27 }
 0x210   :  { %191 = vxpose.xlu1.b32.start.end [1/1] (short) (narrow) %v190_v28, 8 }
 0x2b4   :  { %v207_v29 = vpop.trf.xlu1 }
 0x2b5   :  { %224 = vst.msk [vmem:[#allocation12] sm:$0x1] %vm223_vm5, %v207_v29 }
 0x2b6   :  { %235 = dma.vmem_to_hbm [thread:$0]  %s231_s5, 16, %s233_s12, [#allocation6]  }
 0x2b7   :  { %399 = dma.done.wait [#allocation6], 16  }
 0x2b8   :  { %400 = vsyncadd [#allocation6], 4294967280 }
 0x2b9   :  { %240 = vsyncpa [#allocation5], 1 }
 0x2ba   :  { %241 = vsyncpa [#allocation8], 1 }
 0x2bb   :  { %242 = vsyncpa [#allocation11], 1 }
 0x2bc   :  { %243 = vsyncpa [#allocation6], 1 }

</bundles_post_ra>
